<compile_context>
chip_gen: v5e
topology: v5e:2x2
jax: 0.10.0
libtpu: 0.0.40
codegen_flags: <defaults>
</compile_context>

<pallas_src>
import math
import functools

import jax
import jax.numpy as jnp
from jax.experimental import pallas as pl
from jax.experimental.pallas import tpu as pltpu


def _gelu_erf(x):
    # exact erf-based gelu, matching the reference torch implementation
    return x * 0.5 * (1.0 + jax.lax.erf(x * (1.0 / math.sqrt(2.0))))


def intermediate_kernel(x_ref, w1_ref, b1_ref, w2_ref, b2_ref, g_ref, beta_ref,
                        o_ref, *, eps):
    # One row-tile of the input: (tm, H).  Keep matmul operands in their native
    # (possibly bf16) dtype; accumulate in f32 on the MXU.
    x = x_ref[...]

    # dense_1: (tm, H) @ (H, 4H) -> f32 acc, + bias
    h = jnp.dot(x, w1_ref[...], preferred_element_type=jnp.float32)
    h = h + b1_ref[...].astype(jnp.float32)

    # activation (gelu, erf form) in f32 (v5e-safe: no bf16 VPU/EUP needed)
    h = _gelu_erf(h)

    # dense_2: (tm, 4H) @ (4H, H) -> f32 acc, + bias
    h = jnp.dot(h.astype(w2_ref.dtype), w2_ref[...],
                preferred_element_type=jnp.float32)
    h = h + b2_ref[...].astype(jnp.float32)

    # dropout: inference / eval mode -> identity
    # TODO(synk): training-mode dropout (prng mask + 1/(1-p) scale) not emitted.

    # residual + LayerNorm over the hidden axis.
    # Single cross-lane pass: mean and mean-of-squares, var = E[y^2] - mean^2,
    # then rsqrt on the EUP; gamma folded into the rstd multiply.
    y = h + x.astype(jnp.float32)
    mean = jnp.mean(y, axis=-1, keepdims=True)
    mean_sq = jnp.mean(y * y, axis=-1, keepdims=True)
    var = mean_sq - mean * mean
    rstd = jax.lax.rsqrt(var + eps)
    scale = g_ref[...].astype(jnp.float32) * rstd              # (tm, H)
    out = (y - mean) * scale + beta_ref[...].astype(jnp.float32)

    o_ref[...] = out.astype(o_ref.dtype)


def _round_up(a, m):
    return (a + m - 1) // m * m


def intermediate_forward(x, w1, b1, w2, b2, gamma, beta, *, eps=1e-12, tm=256):
    """x: [rows, H] (any dtype the MXU accepts, e.g. f32 or bf16). Returns [rows, H]."""
    rows, H = x.shape
    H4 = w1.shape[1]

    # Row tile: big enough to feed the MXU / amortize grid-step overhead, but
    # no larger than the (padded) row count; multiple of 8 sublanes.
    tm = max(8, min(_round_up(tm, 8), _round_up(rows, 8)))
    rows_p = _round_up(rows, tm)
    x_p = x if rows_p == rows else jnp.pad(x, ((0, rows_p - rows), (0, 0)))

    grid = (rows_p // tm,)

    # Rough VMEM budget: double-buffered params + double-buffered x/out tiles
    # + f32 intermediates, with margin; clamp to a sane range.
    bpe = lambda a: jnp.dtype(a.dtype).itemsize
    est = (2 * (w1.size * bpe(w1) + w2.size * bpe(w2)
                + b1.size * bpe(b1) + b2.size * bpe(b2)
                + gamma.size * bpe(gamma) + beta.size * bpe(beta))
           + 2 * tm * H * bpe(x) + 2 * tm * H * bpe(x)
           + 4 * tm * (H4 + 2 * H) * 4)
    vmem_limit = int(min(max(2 * est, 32 * 1024 * 1024), 100 * 1024 * 1024))

    kernel = functools.partial(intermediate_kernel, eps=eps)

    out = pl.pallas_call(
        kernel,
        out_shape=jax.ShapeDtypeStruct((rows_p, H), x.dtype),
        grid_spec=pltpu.PrefetchScalarGridSpec(
            num_scalar_prefetch=0,
            grid=grid,
            in_specs=[
                pl.BlockSpec((tm, H), lambda i: (i, 0)),     # x row-tile
                pl.BlockSpec((H, H4), lambda i: (0, 0)),     # w1 (resident)
                pl.BlockSpec((1, H4), lambda i: (0, 0)),     # b1
                pl.BlockSpec((H4, H), lambda i: (0, 0)),     # w2 (resident)
                pl.BlockSpec((1, H), lambda i: (0, 0)),      # b2
                pl.BlockSpec((1, H), lambda i: (0, 0)),      # ln weight
                pl.BlockSpec((1, H), lambda i: (0, 0)),      # ln bias
            ],
            out_specs=pl.BlockSpec((tm, H), lambda i: (i, 0)),
        ),
        compiler_params=pltpu.CompilerParams(
            dimension_semantics=("parallel",),
            vmem_limit_bytes=vmem_limit),
    )(x_p, w1, b1, w2, b2, gamma, beta)

    return out[:rows] if rows_p != rows else out


def reference_forward(x, w1, b1, w2, b2, gamma, beta, eps=1e-12):
    h = x @ w1 + b1
    h = _gelu_erf(h)
    h = h @ w2 + b2
    y = h + x
    u = jnp.mean(y, axis=-1, keepdims=True)
    s = jnp.mean((y - u) ** 2, axis=-1, keepdims=True)
    y = (y - u) / jnp.sqrt(s + eps)
    return gamma * y + beta


if __name__ == "__main__":
    # Small shapes implied by the module: hidden_size=32, intermediate=4*32=128
    batch, seq, hidden = 2, 8, 32
    key = jax.random.PRNGKey(0)
    k_x, k_w1, k_b1, k_w2, k_b2 = jax.random.split(key, 5)

    x = jax.random.normal(k_x, (batch, seq, hidden), dtype=jnp.float32)

    # Deterministic parameter init (nn.Linear-like scale), stored as [in, out].
    w1 = jax.random.normal(k_w1, (hidden, 4 * hidden), jnp.float32) / math.sqrt(hidden)
    b1 = jax.random.normal(k_b1, (1, 4 * hidden), jnp.float32) * 0.02
    w2 = jax.random.normal(k_w2, (4 * hidden, hidden), jnp.float32) / math.sqrt(4 * hidden)
    b2 = jax.random.normal(k_b2, (1, hidden), jnp.float32) * 0.02
    gamma = jnp.ones((1, hidden), jnp.float32)   # LayerNorm.weight
    beta = jnp.zeros((1, hidden), jnp.float32)   # LayerNorm.bias

    x2d = x.reshape(batch * seq, hidden)

    out = intermediate_forward(x2d, w1, b1, w2, b2, gamma, beta)
    out = jax.block_until_ready(out)
    out = out.reshape(batch, seq, hidden)

    ref = reference_forward(x2d, w1, b1, w2, b2, gamma, beta).reshape(batch, seq, hidden)
    assert out.shape == (batch, seq, hidden)
    assert jnp.allclose(out, ref, atol=2e-5, rtol=2e-5), "mismatch vs JAX reference"

    print("KERNEL_OK")
</pallas_src>

<mosaic_0001>
module attributes {stable_mosaic.version = 11 : i64} {
  func.func @intermediate_kernel(%arg0: i32, %arg1: memref<16x32xf32, #tpu.memory_space<vmem>>, %arg2: memref<32x128xf32, #tpu.memory_space<vmem>>, %arg3: memref<1x128xf32, #tpu.memory_space<vmem>>, %arg4: memref<128x32xf32, #tpu.memory_space<vmem>>, %arg5: memref<1x32xf32, #tpu.memory_space<vmem>>, %arg6: memref<1x32xf32, #tpu.memory_space<vmem>>, %arg7: memref<1x32xf32, #tpu.memory_space<vmem>>, %arg8: memref<16x32xf32, #tpu.memory_space<vmem>>) attributes {dimension_semantics = [#tpu.dimension_semantics<parallel>], iteration_bounds = array<i64: 1>, scalar_prefetch = 0 : i64, scratch_operands = 0 : i64, tpu.core_type = #tpu.core_type<tc>, window_params = [{transform_indices = @transform_0, window_bounds = array<i64: 16, 32>}, {pipeline_mode = #tpu.pipeline_mode<synchronous>, transform_indices = @transform_1, window_bounds = array<i64: 32, 128>}, {pipeline_mode = #tpu.pipeline_mode<synchronous>, transform_indices = @transform_2, window_bounds = array<i64: 1, 128>}, {pipeline_mode = #tpu.pipeline_mode<synchronous>, transform_indices = @transform_3, window_bounds = array<i64: 128, 32>}, {pipeline_mode = #tpu.pipeline_mode<synchronous>, transform_indices = @transform_4, window_bounds = array<i64: 1, 32>}, {pipeline_mode = #tpu.pipeline_mode<synchronous>, transform_indices = @transform_5, window_bounds = array<i64: 1, 32>}, {pipeline_mode = #tpu.pipeline_mode<synchronous>, transform_indices = @transform_6, window_bounds = array<i64: 1, 32>}, {transform_indices = @transform_7, window_bounds = array<i64: 16, 32>}]} {
    %c0 = arith.constant 0 : index
    %c0_0 = arith.constant 0 : index
    %0 = vector.load %arg1[%c0, %c0_0] : memref<16x32xf32, #tpu.memory_space<vmem>>, vector<16x32xf32>
    %c0_1 = arith.constant 0 : index
    %c0_2 = arith.constant 0 : index
    %1 = vector.load %arg2[%c0_1, %c0_2] : memref<32x128xf32, #tpu.memory_space<vmem>>, vector<32x128xf32>
    %cst = arith.constant dense<0.000000e+00> : vector<16x128xf32>
    %2 = tpu.matmul %0, %1, %cst {dimension_numbers = #tpu.dot_dimension_numbers<[1], [0], [0], [1], [0, 0, 1, 1], [], []>} : vector<16x32xf32>, vector<32x128xf32>, vector<16x128xf32> -> vector<16x128xf32>
    %c0_3 = arith.constant 0 : index
    %c0_4 = arith.constant 0 : index
    %3 = vector.load %arg3[%c0_3, %c0_4] : memref<1x128xf32, #tpu.memory_space<vmem>>, vector<1x128xf32>
    %4 = vector.broadcast %3 : vector<1x128xf32> to vector<16x128xf32>
    %5 = arith.addf %2, %4 : vector<16x128xf32>
    %cst_5 = arith.constant 5.000000e-01 : f32
    %6 = vector.broadcast %cst_5 : f32 to vector<16x128xf32>
    %7 = arith.mulf %5, %6 : vector<16x128xf32>
    %cst_6 = arith.constant 0.707106769 : f32
    %8 = vector.broadcast %cst_6 : f32 to vector<16x128xf32>
    %9 = arith.mulf %5, %8 : vector<16x128xf32>
    %10 = math.erf %9 : vector<16x128xf32>
    %cst_7 = arith.constant 1.000000e+00 : f32
    %11 = vector.broadcast %cst_7 : f32 to vector<16x128xf32>
    %12 = arith.addf %11, %10 : vector<16x128xf32>
    %13 = arith.mulf %7, %12 : vector<16x128xf32>
    %c0_8 = arith.constant 0 : index
    %c0_9 = arith.constant 0 : index
    %14 = vector.load %arg4[%c0_8, %c0_9] : memref<128x32xf32, #tpu.memory_space<vmem>>, vector<128x32xf32>
    %cst_10 = arith.constant dense<0.000000e+00> : vector<16x32xf32>
    %15 = tpu.matmul %13, %14, %cst_10 {dimension_numbers = #tpu.dot_dimension_numbers<[1], [0], [0], [1], [0, 0, 1, 1], [], []>} : vector<16x128xf32>, vector<128x32xf32>, vector<16x32xf32> -> vector<16x32xf32>
    %c0_11 = arith.constant 0 : index
    %c0_12 = arith.constant 0 : index
    %16 = vector.load %arg5[%c0_11, %c0_12] : memref<1x32xf32, #tpu.memory_space<vmem>>, vector<1x32xf32>
    %17 = vector.broadcast %16 : vector<1x32xf32> to vector<16x32xf32>
    %18 = arith.addf %15, %17 : vector<16x32xf32>
    %19 = arith.addf %18, %0 : vector<16x32xf32>
    %cst_13 = arith.constant dense<0.000000e+00> : vector<16xf32>
    %20 = vector.multi_reduction <add>, %19, %cst_13 [1] : vector<16x32xf32> to vector<16xf32>
    %21 = vector.shape_cast %20 : vector<16xf32> to vector<16x1xf32>
    %cst_14 = arith.constant 3.200000e+01 : f32
    %22 = vector.broadcast %cst_14 : f32 to vector<16x1xf32>
    %23 = arith.divf %21, %22 : vector<16x1xf32>
    %24 = arith.mulf %19, %19 : vector<16x32xf32>
    %cst_15 = arith.constant dense<0.000000e+00> : vector<16xf32>
    %25 = vector.multi_reduction <add>, %24, %cst_15 [1] : vector<16x32xf32> to vector<16xf32>
    %26 = vector.shape_cast %25 : vector<16xf32> to vector<16x1xf32>
    %cst_16 = arith.constant 3.200000e+01 : f32
    %27 = vector.broadcast %cst_16 : f32 to vector<16x1xf32>
    %28 = arith.divf %26, %27 : vector<16x1xf32>
    %29 = arith.mulf %23, %23 : vector<16x1xf32>
    %30 = arith.subf %28, %29 : vector<16x1xf32>
    %cst_17 = arith.constant 9.99999996E-13 : f32
    %31 = vector.broadcast %cst_17 : f32 to vector<16x1xf32>
    %32 = arith.addf %30, %31 : vector<16x1xf32>
    %33 = math.rsqrt %32 : vector<16x1xf32>
    %c0_18 = arith.constant 0 : index
    %c0_19 = arith.constant 0 : index
    %34 = vector.load %arg6[%c0_18, %c0_19] : memref<1x32xf32, #tpu.memory_space<vmem>>, vector<1x32xf32>
    %35 = vector.broadcast %34 : vector<1x32xf32> to vector<16x32xf32>
    %36 = vector.broadcast %33 : vector<16x1xf32> to vector<16x32xf32>
    %37 = arith.mulf %35, %36 : vector<16x32xf32>
    %38 = vector.broadcast %23 : vector<16x1xf32> to vector<16x32xf32>
    %39 = arith.subf %19, %38 : vector<16x32xf32>
    %40 = arith.mulf %39, %37 : vector<16x32xf32>
    %c0_20 = arith.constant 0 : index
    %c0_21 = arith.constant 0 : index
    %41 = vector.load %arg7[%c0_20, %c0_21] : memref<1x32xf32, #tpu.memory_space<vmem>>, vector<1x32xf32>
    %42 = vector.broadcast %41 : vector<1x32xf32> to vector<16x32xf32>
    %43 = arith.addf %40, %42 : vector<16x32xf32>
    %c0_22 = arith.constant 0 : index
    %c0_23 = arith.constant 0 : index
    %44 = vector.load %arg8[%c0_22, %c0_23] : memref<16x32xf32, #tpu.memory_space<vmem>>, vector<16x32xf32>
    tpu.vector_store %arg8[%c0_22, %c0_23], %43 {strides = array<i32>} : memref<16x32xf32, #tpu.memory_space<vmem>>, vector<16x32xf32>,
    return
  }
  func.func @transform_0(%arg0: i32) -> (i32, i32) {
    %c0_i32 = arith.constant 0 : i32
    %c0_i32_0 = arith.constant 0 : i32
    return %arg0, %c0_i32 : i32, i32
  }
  func.func @transform_1(%arg0: i32) -> (i32, i32) {
    %c0_i32 = arith.constant 0 : i32
    %c0_i32_0 = arith.constant 0 : i32
    %c0_i32_1 = arith.constant 0 : i32
    return %c0_i32, %c0_i32_0 : i32, i32
  }
  func.func @transform_2(%arg0: i32) -> (i32, i32) {
    %c0_i32 = arith.constant 0 : i32
    %c0_i32_0 = arith.constant 0 : i32
    %c0_i32_1 = arith.constant 0 : i32
    return %c0_i32, %c0_i32_0 : i32, i32
  }
  func.func @transform_3(%arg0: i32) -> (i32, i32) {
    %c0_i32 = arith.constant 0 : i32
    %c0_i32_0 = arith.constant 0 : i32
    %c0_i32_1 = arith.constant 0 : i32
    return %c0_i32, %c0_i32_0 : i32, i32
  }
  func.func @transform_4(%arg0: i32) -> (i32, i32) {
    %c0_i32 = arith.constant 0 : i32
    %c0_i32_0 = arith.constant 0 : i32
    %c0_i32_1 = arith.constant 0 : i32
    return %c0_i32, %c0_i32_0 : i32, i32
  }
  func.func @transform_5(%arg0: i32) -> (i32, i32) {
    %c0_i32 = arith.constant 0 : i32
    %c0_i32_0 = arith.constant 0 : i32
    %c0_i32_1 = arith.constant 0 : i32
    return %c0_i32, %c0_i32_0 : i32, i32
  }
  func.func @transform_6(%arg0: i32) -> (i32, i32) {
    %c0_i32 = arith.constant 0 : i32
    %c0_i32_0 = arith.constant 0 : i32
    %c0_i32_1 = arith.constant 0 : i32
    return %c0_i32, %c0_i32_0 : i32, i32
  }
  func.func @transform_7(%arg0: i32) -> (i32, i32) {
    %c0_i32 = arith.constant 0 : i32
    %c0_i32_0 = arith.constant 0 : i32
    return %arg0, %c0_i32 : i32, i32
  }
}

</mosaic_0001>

<bundles_post_ra>
// kernel: tpu_custom_call.1
= control target key start
LH: loop header
LB: loop body
LE: loop exit
PB: predicated region body
PF: predicated region fallthrough
CT: control target
= control target key end

     0   :  { %s528_s0 = inlined_call_operand.vmem [shape: f32[16,32], index: 0, kind: input, shape index: {}]   ;;  %s529_s1 = inlined_call_operand.vmem [shape: f32[32,128], index: 1, kind: input, shape index: {}]   ;;  %s530_s2 = inlined_call_operand.vmem [shape: f32[1,128], index: 2, kind: input, shape index: {}]   ;;  %s531_s3 = inlined_call_operand.vmem [shape: f32[128,32], index: 3, kind: input, shape index: {}]   ;;  %s532_s4 = inlined_call_operand.vmem [shape: f32[1,32], index: 4, kind: input, shape index: {}]   ;;  %s533_s5 = inlined_call_operand.vmem [shape: f32[1,32], index: 5, kind: input, shape index: {}]   ;;  %s534_s6 = inlined_call_operand.vmem [shape: f32[1,32], index: 6, kind: input, shape index: {}]   ;;  %s535_s7 = inlined_call_operand.hbm [shape: f32[16,32], index: 7, kind: output, shape index: {}]  }
   0x1   :  { %v32_v0 = vld [vmem:[%s529_s1 + $0x18] sm:$0xff]  ;;  %v31_v1 = vld [vmem:[%s529_s1 + $0x10] sm:$0xff]  ;;  %v30_v2 = vld [vmem:[%s529_s1 + $0x8] sm:$0xff] }
   0x2   :  { %56 = vmatpush.msra.mxu0 %v32_v0 }
   0x4   :  { %57 = vmatpush.msra.mxu0 %v31_v1 }
   0x5   :  { %12 = vsyncpa [#allocation3], 0  ;;  %v29_v3 = vld [vmem:[%s529_s1] sm:$0xff]  ;;  %vm37_vm0 = vcmask 261120   ;;  %v417_v5 = vld [vmem:[%s528_s0 + $0x8] sm:$0xff]  ;;  %s275_s25 = sshll.u32 %s535_s7, 4  ;;  %s276_s25 = int_to_ptr.hbm [resolvable:$true] %s275_s25 }
   0x6   :  { %58 = vmatpush.msra.mxu0 %v30_v2  ;;  %v410_v4 = vld [vmem:[%s528_s0] sm:$0xff]  ;;  %v170_v6 = vld [vmem:[%s531_s3 + $0x78] sm:$0xff]  ;;  %v169_v7 = vld [vmem:[%s531_s3 + $0x70] sm:$0xff]  ;;  %s353_s26 = smov 128  }
   0x7   :  { %175 = vmatpush.msra.mxu1 %v170_v6  ;;  %291 = vmatpush.msra.mxu2 %v170_v6  ;;  %v168_v8 = vld [vmem:[%s531_s3 + $0x68] sm:$0xff]  ;;  %v167_v9 = vld [vmem:[%s531_s3 + $0x60] sm:$0xff]  ;;  %v166_v11 = vld [vmem:[%s531_s3 + $0x58] sm:$0xff] }
   0x8   :  { %59 = vmatpush.msra.mxu0 %v29_v3  ;;  %v311_v10 = vld [vmem:[%s530_s2] ss:$0 sm:$0xff]  ;;  %v165_v13 = vld [vmem:[%s531_s3 + $0x50] sm:$0xff]  ;;  %v164_v15 = vld [vmem:[%s531_s3 + $0x48] sm:$0xff]  ;;  %s354_s2 = smov 8  }
   0x9   :  { %287 = vmatmul.msk.f32.vlgmr.msra.gmra.mxu0 %vm37_vm0, %v410_v4  ;;  %176 = vmatpush.msra.mxu1 %v169_v7  ;;  %v163_v17 = vld [vmem:[%s531_s3 + $0x40] sm:$0xff]  ;;  %v162_v19 = vld [vmem:[%s531_s3 + $0x38] sm:$0xff]  ;;  %v161_v20 = vld [vmem:[%s531_s3 + $0x30] sm:$0xff] }
   0xa   :  { %292 = vmatpush.msra.mxu2 %v169_v7  ;;  %v160_v23 = vld [vmem:[%s531_s3 + $0x28] sm:$0xff]  ;;  %v159_v27 = vld [vmem:[%s531_s3 + $0x20] sm:$0xff]  ;;  %v158_v30 = vld [vmem:[%s531_s3 + $0x18] sm:$0xff] }
   0xb   :  { %177 = vmatpush.msra.mxu1 %v168_v8  ;;  %v157_v34 = vld [vmem:[%s531_s3 + $0x10] sm:$0xff]  ;;  %v156_v37 = vld [vmem:[%s531_s3 + $0x8] sm:$0xff]  ;;  %v155_v42 = vld [vmem:[%s531_s3] sm:$0xff] }
   0xc   :  { %293 = vmatpush.msra.mxu2 %v168_v8 }
   0xd   :  { %178 = vmatpush.msra.mxu1 %v167_v9 }
   0xe   :  { %294 = vmatpush.msra.mxu2 %v167_v9 }
   0xf   :  { %179 = vmatpush.msra.mxu1 %v166_v11 }
  0x10   :  { %295 = vmatpush.msra.mxu2 %v166_v11 }
  0x11   :  { %288 = vmatmul.msk.f32.gmra.mxu0 %vm37_vm0, %v417_v5  ;;  %180 = vmatpush.msra.mxu1 %v165_v13 }
  0x12   :  { %296 = vmatpush.msra.mxu2 %v165_v13 }
  0x13   :  { %181 = vmatpush.msra.mxu1 %v164_v15 }
  0x14   :  { %297 = vmatpush.msra.mxu2 %v164_v15 }
  0x15   :  { %182 = vmatpush.msra.mxu1 %v163_v17 }
  0x16   :  { %298 = vmatpush.msra.mxu2 %v163_v17 }
  0x17   :  { %183 = vmatpush.msra.mxu1 %v162_v19 }
  0x18   :  { %299 = vmatpush.msra.mxu2 %v162_v19 }
  0x19   :  { %184 = vmatpush.msra.mxu1 %v161_v20 }
  0x1a   :  { %300 = vmatpush.msra.mxu2 %v161_v20 }
  0x1b   :  { %185 = vmatpush.msra.mxu1 %v160_v23 }
  0x1c   :  { %301 = vmatpush.msra.mxu2 %v160_v23 }
  0x1d   :  { %186 = vmatpush.msra.mxu1 %v159_v27 }
  0x1e   :  { %302 = vmatpush.msra.mxu2 %v159_v27 }
  0x1f   :  { %187 = vmatpush.msra.mxu1 %v158_v30 }
  0x20   :  { %303 = vmatpush.msra.mxu2 %v158_v30 }
  0x21   :  { %188 = vmatpush.msra.mxu1 %v157_v34 }
  0x22   :  { %304 = vmatpush.msra.mxu2 %v157_v34 }
  0x23   :  { %189 = vmatpush.msra.mxu1 %v156_v37 }
  0x24   :  { %305 = vmatpush.msra.mxu2 %v156_v37 }
  0x25   :  { %190 = vmatpush.msra.mxu1 %v155_v42 }
  0x26   :  { %306 = vmatpush.msra.mxu2 %v155_v42 }
  0x86   :  { %v61_v12 = vpop.f32.mrf.mxu0 }
  0x87   :  { %v442_v14 = vadd.f32 %v311_v10, %v61_v12 }
  0x89   :  { %v448_v16 = vmul.f32 0.70710677, %v442_v14 }
  0x8b   :  { %v71_v18 = vmul.f32 %v448_v16, %v448_v16 }
  0x8d   :  { %v461_v21 = vmin.f32 %v71_v18, 16.0 }
  0x8e   :  { %v64_v22 = vpop.f32.mrf.mxu0 }
  0x8f   :  { %v73_v24 = vmul.f32 2.1237322e-06, %v461_v21  ;;  %v467_v25 = vadd.f32 %v311_v10, %v64_v22  ;;  %v84_v26 = vmul.f32 3.8918573e-05, %v461_v21 }
  0x91   :  { %v74_v28 = vadd.f32 0.00028619796, %v73_v24  ;;  %v474_v29 = vmul.f32 0.70710677, %v467_v25  ;;  %v85_v31 = vadd.f32 0.001143296, %v84_v26 }
  0x93   :  { %v75_v32 = vmul.f32 %v74_v28, %v461_v21  ;;  %v111_v33 = vmul.f32 %v474_v29, %v474_v29  ;;  %v86_v35 = vmul.f32 %v85_v31, %v461_v21 }
  0x95   :  { %v112_v36 = vmin.f32 %v111_v33, 16.0  ;;  %v87_v38 = vadd.f32 0.014752088, %v86_v35  ;;  %v76_v39 = vadd.f32 0.0036580483, %v75_v32  ;;  %v67_v35 = vmul.f32 0.5, %v442_v14 }
  0x96   :  { %v312_v14 = vld [vmem:[%s532_s4] ss:$0 sm:$0xff] }
  0x97   :  { %v113_v40 = vmul.f32 2.1237322e-06, %v112_v36  ;;  %v124_v41 = vmul.f32 3.8918573e-05, %v112_v36  ;;  %v88_v43 = vmul.f32 %v87_v38, %v461_v21  ;;  %v77_v47 = vmul.f32 %v76_v39, %v461_v21 }
  0x99   :  { %v114_v44 = vadd.f32 0.00028619796, %v113_v40  ;;  %v125_v45 = vadd.f32 0.001143296, %v124_v41  ;;  %v89_v46 = vadd.f32 0.112945676, %v88_v43 }
  0x9a   :  { %v78_v54 = vadd.f32 0.05243302, %v77_v47  ;;  %v68_v43 = vmul.f32 0.5, %v467_v25 }
  0x9b   :  { %v115_v48 = vmul.f32 %v114_v44, %v112_v36  ;;  %v126_v49 = vmul.f32 %v125_v45, %v112_v36  ;;  %v90_v50 = vmul.f32 %v89_v46, %v461_v21 }
  0x9c   :  { %v79_v60 = vmul.f32 %v78_v54, %v461_v21 }
  0x9d   :  { %v127_v51 = vadd.f32 0.014752088, %v126_v49  ;;  %v116_v52 = vadd.f32 0.0036580483, %v115_v48  ;;  %v91_v53 = vadd.f32 0.4994258, %v90_v50 }
  0x9e   :  { %v80_v0 = vadd.f32 0.18741608, %v79_v60 }
  0x9f   :  { %v128_v55 = vmul.f32 %v127_v51, %v112_v36  ;;  %v92_v56 = vmul.f32 %v91_v53, %v461_v21  ;;  %v117_v58 = vmul.f32 %v116_v52, %v112_v36 }
  0xa0   :  { %v81_v7 = vmul.f32 %v80_v0, %v461_v21 }
  0xa1   :  { %v129_v57 = vadd.f32 0.112945676, %v128_v55  ;;  %v93_v59 = vadd.f32 1.0, %v92_v56  ;;  %v118_v63 = vadd.f32 0.05243302, %v117_v58  ;;  %v351_v55 = vmov 32.0  }
  0xa2   :  { %v82_v12 = vadd.f32 1.1283791, %v81_v7 }
  0xa3   :  { %v130_v61 = vmul.f32 %v129_v57, %v112_v36  ;;  %315 = vrcp.f32 %v93_v59  ;;  %v119_v6 = vmul.f32 %v118_v63, %v112_v36  ;;  %v105_v11 = vand.u32 2147483648, %v93_v59 }
  0xa4   :  { %v103_v15 = vand.u32 2147483647, %v93_v59  ;;  %vm99_vm2 = vweird.f32 %v93_v59  ;;  %v83_v23 = vmul.f32 %v82_v12, %v448_v16 }
  0xa5   :  { %v131_v62 = vadd.f32 0.4994258, %v130_v61  ;;  %v120_v10 = vadd.f32 0.18741608, %v119_v6  ;;  %v106_v20 = vor.u32 1.1754944e-38, %v105_v11 }
  0xa6   :  { %vm104_vm4 = vcmp.eq.f32.partialorder %v103_v15, 8.507059e+37 }
  0xa7   :  { %v132_v1 = vmul.f32 %v131_v62, %v112_v36  ;;  %v121_v19 = vmul.f32 %v120_v10, %v112_v36 }
  0xa9   :  { %v133_v2 = vadd.f32 1.0, %v132_v1  ;;  %v316_v3 = vpop.eup %315  ;;  %v122_v30 = vadd.f32 1.1283791, %v121_v19 }
  0xaa   :  { %v95_v8 = vmul.f32 %v316_v3, %v93_v59  ;;  %vm100_vm1 = vweird.f32 %v316_v3 }
  0xab   :  { %317 = vrcp.f32 %v133_v2  ;;  %vm101_vm3 = vmor %vm99_vm2, %vm100_vm1  ;;  %v145_v28 = vand.u32 2147483648, %v133_v2  ;;  %v143_v32 = vand.u32 2147483647, %v133_v2  ;;  %vm139_vm6 = vweird.f32 %v133_v2 }
  0xac   :  { %v96_v9 = vsub.f32 1.0, %v95_v8  ;;  %v123_v16 = vmul.f32 %v122_v30, %v474_v29  ;;  %319 = vrcp.f32 %v351_v55 }
  0xad   :  { %v146_v37 = vor.u32 1.1754944e-38, %v145_v28  ;;  %vm144_vm8 = vcmp.eq.f32.partialorder %v143_v32, 8.507059e+37 }
  0xae   :  { %v97_v13 = vmul.f32 %v316_v3, %v96_v9 }
  0xb0   :  { %v98_v18 = vadd.f32 %v316_v3, %v97_v13 }
  0xb1   :  { %v318_v17 = vpop.eup %317 }
  0xb2   :  { %v135_v22 = vmul.f32 %v318_v17, %v133_v2  ;;  %v102_v24 = vsel %vm101_vm3, %v316_v3, %v98_v18  ;;  %vm140_vm5 = vweird.f32 %v318_v17  ;;  %v320_v56 = vpop.eup %319 }
  0xb3   :  { %v107_v21 = vsel %vm104_vm4, %v106_v20, %v102_v24  ;;  %vm141_vm7 = vmor %vm139_vm6, %vm140_vm5  ;;  %v207_v57 = vmul.f32 32.0, %v320_v56  ;;  %vm211_vm9 = vweird.f32 %v320_v56  ;;  %v313_v20 = vld [vmem:[%s533_s5] ss:$0 sm:$0xff]  ;;  %s352_s5 = smov [#allocation2]  }
  0xb4   :  { %v136_v26 = vsub.f32 1.0, %v135_v22  ;;  %v108_v27 = vmul.f32 %v107_v21, %v83_v23  ;;  %s273_s23 = sshll.u32 %s352_s5, 4  ;;  %s274_s23 = int_to_ptr.vmem [resolvable:$true] %s273_s23 }
  0xb5   :  { %v208_v58 = vsub.f32 1.0, %v207_v57 }
  0xb6   :  { %v137_v31 = vmul.f32 %v318_v17, %v136_v26  ;;  %v289_v33 = vclamps-f32 %v108_v27, 1.0  ;;  %v314_v26 = vld [vmem:[%s534_s6] ss:$0 sm:$0xff] }
  0xb7   :  { %v209_v59 = vmul.f32 %v320_v56, %v208_v58 }
  0xb8   :  { %v138_v34 = vadd.f32 %v318_v17, %v137_v31  ;;  %v151_v36 = vadd.f32 1.0, %v289_v33 }
  0xb9   :  { %v210_v60 = vadd.f32 %v320_v56, %v209_v59 }
  0xba   :  { %v142_v38 = vsel %vm141_vm7, %v318_v17, %v138_v34  ;;  %v153_v39 = vmul.f32 %v151_v36, %v67_v35 }
  0xbb   :  { %v147_v40 = vsel %vm144_vm8, %v146_v37, %v142_v38 }
  0xbc   :  { %v148_v41 = vmul.f32 %v147_v40, %v123_v16  ;;  %191 = vmatmul.f32.vlgmr.msra.gmra.mxu1 %v153_v39 }
  0xbe   :  { %v290_v42 = vclamps-f32 %v148_v41, 1.0 }
  0xc0   :  { %v152_v44 = vadd.f32 1.0, %v290_v42 }
  0xc2   :  { %v154_v45 = vmul.f32 %v152_v44, %v68_v43 }
  0xc4   :  { %194 = vmatmul.f32.vlgmr.msra.gmra.mxu2 %v154_v45 }
 0x139   :  { %v192_v46 = vpop.f32.mrf.mxu1 }
 0x13a   :  { %v193_v47 = vadd.f32 %v312_v14, %v192_v46 }
 0x13c   :  { %v198_v29 = vadd.f32 %v193_v47, %v410_v4 }
 0x13e   :  { %v200_v48 = vsel %vm37_vm0, %v198_v29, 0.0  ;;  %v215_v49 = vmul.f32 %v198_v29, %v198_v29 }
 0x13f   :  { %201 = vadd.xlane.f32.xlu0 %v200_v48 }
 0x140   :  { %v217_v50 = vsel %vm37_vm0, %v215_v49, 0.0 }
 0x141   :  { %218 = vadd.xlane.f32.xlu1 %v217_v50 }
 0x147   :  { %v195_v51 = vpop.f32.mrf.mxu2 }
 0x148   :  { %v196_v25 = vadd.f32 %v312_v14, %v195_v51 }
 0x14a   :  { %v509_v52 = vadd.f32 %v196_v25, %v417_v5  ;;  %v212_v5 = vsel %vm211_vm9, %v320_v56, %v210_v60 }
 0x14c   :  { %v203_v53 = vsel %vm37_vm0, %v509_v52, 0.0  ;;  %v216_v54 = vmul.f32 %v509_v52, %v509_v52 }
 0x14d   :  { %204 = vadd.xlane.f32.xlu0 %v203_v53 }
 0x14e   :  { %v220_v4 = vsel %vm37_vm0, %v216_v54, 0.0 }
 0x14f   :  { %221 = vadd.xlane.f32.xlu1 %v220_v4 }
 0x1b2   :  { %v202_v61 = vpop.xlane.xlu0 %201 }
 0x1b3   :  { %v213_v62 = vmul.f32 %v212_v5, %v202_v61 }
 0x1b4   :  { %v219_v63 = vpop.xlane.xlu1 %218 }
 0x1b5   :  { %v225_v0 = vmul.f32 %v213_v62, %v213_v62  ;;  %v223_v1 = vmul.f32 %v219_v63, %v212_v5  ;;  %v257_v24 = vsub.f32 %v198_v29, %v213_v62 }
 0x1b7   :  { %v227_v2 = vsub.f32 %v223_v1, %v225_v0 }
 0x1b9   :  { %v229_v3 = vadd.f32 1e-12, %v227_v2 }
 0x1bb   :  { %321 = vrsqrt.f32 %v229_v3  ;;  %vm237_vm11 = vweird.f32 %v229_v3 }
 0x1c0   :  { %v205_v6 = vpop.xlane.xlu0 %204 }
 0x1c1   :  { %v214_v7 = vmul.f32 %v212_v5, %v205_v6  ;;  %v322_v8 = vpop.eup %321 }
 0x1c2   :  { %v222_v9 = vpop.xlane.xlu1 %221  ;;  %v232_v10 = vmul.f32 %v322_v8, %v229_v3  ;;  %vm238_vm10 = vweird.f32 %v322_v8 }
 0x1c3   :  { %v226_v11 = vmul.f32 %v214_v7, %v214_v7  ;;  %v224_v12 = vmul.f32 %v222_v9, %v212_v5  ;;  %vm239_vm12 = vmor %vm237_vm11, %vm238_vm10  ;;  %v258_v37 = vsub.f32 %v509_v52, %v214_v7 }
 0x1c4   :  { %v233_v13 = vmul.f32 %v322_v8, %v232_v10 }
 0x1c5   :  { %v228_v15 = vsub.f32 %v224_v12, %v226_v11 }
 0x1c6   :  { %v234_v17 = vmul.f32 0.5, %v233_v13 }
 0x1c7   :  { %v230_v18 = vadd.f32 1e-12, %v228_v15 }
 0x1c8   :  { %v235_v19 = vsub.f32 1.5, %v234_v17 }
 0x1c9   :  { %323 = vrsqrt.f32 %v230_v18  ;;  %vm247_vm14 = vweird.f32 %v230_v18 }
 0x1ca   :  { %v236_v22 = vmul.f32 %v322_v8, %v235_v19 }
 0x1cc   :  { %v240_v23 = vsel %vm239_vm12, %v322_v8, %v236_v22 }
 0x1cd   :  { %v255_v21 = vmul.f32 %v313_v20, %v240_v23 }
 0x1cf   :  { %v324_v27 = vpop.eup %323  ;;  %v259_v28 = vmul.f32 %v257_v24, %v255_v21 }
 0x1d0   :  { %v242_v30 = vmul.f32 %v324_v27, %v230_v18  ;;  %vm248_vm13 = vweird.f32 %v324_v27 }
 0x1d1   :  { %v265_v31 = vadd.f32 %v314_v26, %v259_v28  ;;  %vm249_vm15 = vmor %vm247_vm14, %vm248_vm13 }
 0x1d2   :  { %v243_v32 = vmul.f32 %v324_v27, %v242_v30 }
 0x1d3   :  { %267 = vst.msk [vmem:[#allocation2] sm:$0xff] %vm37_vm0, %v265_v31 }
 0x1d4   :  { %v244_v33 = vmul.f32 0.5, %v243_v32 }
 0x1d6   :  { %v245_v34 = vsub.f32 1.5, %v244_v33 }
 0x1d8   :  { %v246_v35 = vmul.f32 %v324_v27, %v245_v34 }
 0x1da   :  { %v250_v36 = vsel %vm249_vm15, %v324_v27, %v246_v35 }
 0x1db   :  { %v256_v16 = vmul.f32 %v313_v20, %v250_v36 }
 0x1dd   :  { %v260_v38 = vmul.f32 %v258_v37, %v256_v16 }
 0x1df   :  { %v266_v39 = vadd.f32 %v314_v26, %v260_v38 }
 0x1e1   :  { %268 = vst.msk [vmem:[#allocation2 + $0x8] sm:$0xff] %vm37_vm0, %v266_v39 }
 0x1e2   :  { %281 = dma.vmem_to_hbm [thread:$0]  %s274_s23, 256, %s276_s25, [#allocation3], %s353_s26, %s353_s26, %s354_s2  }
 0x1e3   :  { %349 = dma.done.wait [#allocation3], 256  }
 0x1e4   :  { %350 = vsyncadd [#allocation3], 4294967040 }
 0x1e5   :  { %286 = vsyncpa [#allocation3], 1 }

</bundles_post_ra>
